<compile_context>
chip_gen: v7x
topology: tpu7x:2x2x1
jax: 0.10.0
libtpu: 0.0.40
codegen_flags: <defaults>
</compile_context>

<pallas_src>
import jax
import jax.numpy as jnp
from jax.experimental import pallas as pl
from jax.experimental.pallas import tpu as pltpu

F_IN = 3    # Model.linear1 in_features
F_H = 5     # Model.linear1 out_features == custom linears in_features (adjusted)
F_OUT = 2   # custom linears out_features

MAX_TB = 32768      # lane-axis (batch) tile; multiple of 128; ~6 MiB VMEM total
PALLAS_MIN_B = 4096  # below this, plain XLA fusion beats pallas_call fixed cost


def _fused_kernel(scal_ref, u_ref, v_ref, o_ref):
    """12 VPU broadcast-FMAs; scalars live in SMEM, batch on the 128-lane axis.

    scal layout (14 f32 scalars):
      [0:3]  = Wa[:, 0]   [3:6]  = Wa[:, 1]
      [6:9]  = Wb[:, 0]   [9:12] = Wb[:, 1]
      [12:14]= const
    """
    u0 = u_ref[0:1, :]
    u1 = u_ref[1:2, :]
    u2 = u_ref[2:3, :]
    v0 = v_ref[0:1, :]
    v1 = v_ref[1:2, :]
    v2 = v_ref[2:3, :]
    s = scal_ref
    o0 = (s[0] * u0 + s[1] * u1 + s[2] * u2
          - s[6] * v0 - s[7] * v1 - s[8] * v2 + s[12])
    o1 = (s[3] * u0 + s[4] * u1 + s[5] * u2
          - s[9] * v0 - s[10] * v1 - s[11] * v2 + s[13])
    o_ref[...] = jnp.concatenate([o0, o1], axis=0).astype(o_ref.dtype)


def fold_params(params):
    """One-time algebraic weight folding -> 14 scalars (hoisted out of per-call path)."""
    w1_t = params["w1"].T                       # (F_IN, F_H)
    wc1_t = params["wc1"].T                     # (F_H, F_OUT)
    wc2_t = params["wc2"].T                     # (F_H, F_OUT)
    wa = w1_t @ (2.0 * wc1_t + wc2_t)           # (F_IN, F_OUT)
    wb = w1_t @ wc1_t                           # (F_IN, F_OUT)
    const = params["b1"] @ (wc1_t + wc2_t) + params["bc1"] + params["bc2"]  # (F_OUT,)
    return jnp.concatenate(
        [wa.T.reshape(-1), wb.T.reshape(-1), const.reshape(-1)]
    ).astype(jnp.float32)                       # (14,)


def model_forward(u, v, w, folded, *, tile_b=MAX_TB, force_pallas=False):
    """Pallas-fused forward pass of Model.forward(u, v, w)."""
    del w  # z = linear1(w) is computed-but-unused in the PyTorch forward; skipped.
    B = u.shape[0]

    # Reconstruct the tiny folded matrices (cheap; fuses under jit).
    wa = folded[0:6].reshape(F_OUT, F_IN).T     # (3, 2)
    wb = folded[6:12].reshape(F_OUT, F_IN).T    # (3, 2)
    const = folded[12:14]                       # (2,)

    if (not force_pallas) and B < PALLAS_MIN_B:
        # Small batch: pallas_call fixed cost exceeds the whole op; let XLA fuse it.
        return u @ wa - v @ wb + const

    # ---- lane-dense (feature-major) layout: batch on the 128-lane axis ----
    u_t = u.T        # (F_IN, B)
    v_t = v.T        # (F_IN, B)

    if B <= tile_b:
        tb = B                      # single block; block shape == full array dims
    else:
        tb = tile_b
        assert tb % 128 == 0, "batch tile must be lane-aligned (multiple of 128)"
    nb = pl.cdiv(B, tb)

    out_t = pl.pallas_call(
        _fused_kernel,
        out_shape=jax.ShapeDtypeStruct((F_OUT, B), jnp.float32),
        grid=(nb,),
        in_specs=[
            pl.BlockSpec(memory_space=pltpu.MemorySpace.SMEM),   # 14 folded scalars
            pl.BlockSpec((F_IN, tb), lambda i: (0, i)),          # u^T tile
            pl.BlockSpec((F_IN, tb), lambda i: (0, i)),          # v^T tile
        ],
        out_specs=pl.BlockSpec((F_OUT, tb), lambda i: (0, i)),   # lane-dense output
        compiler_params=pltpu.CompilerParams(
            dimension_semantics=("parallel",),   # independent batch tiles
            vmem_limit_bytes=32 << 20,           # explicit (v5e default is 16 MiB)
        ),
        cost_estimate=pl.CostEstimate(
            flops=24 * B,
            transcendentals=0,
            bytes_accessed=(2 * F_IN + F_OUT) * 4 * B + 14 * 4,
        ),
    )(folded, u_t, v_t)
    return out_t.T   # back to (B, F_OUT)


def init_params(key):
    ks = jax.random.split(key, 6)
    # Model.linear1: Linear(3, 5)
    w1 = jax.random.normal(ks[0], (F_H, F_IN), jnp.float32) * 0.1
    b1 = jax.random.normal(ks[1], (F_H,), jnp.float32) * 0.1
    # CustomModule.linear1 / linear2 (in_features adjusted 2 -> 5, see header note)
    wc1 = jax.random.normal(ks[2], (F_OUT, F_H), jnp.float32) * 0.1
    bc1 = jax.random.normal(ks[3], (F_OUT,), jnp.float32) * 0.1
    wc2 = jax.random.normal(ks[4], (F_OUT, F_H), jnp.float32) * 0.1
    bc2 = jax.random.normal(ks[5], (F_OUT,), jnp.float32) * 0.1
    # Model.linear2 (Linear(5,2)) exists in __init__ but is unused in forward.
    return dict(w1=w1, b1=b1, wc1=wc1, bc1=bc1, wc2=wc2, bc2=bc2)


def reference_forward(u, v, w, p):
    lin = lambda x, W, b: x @ W.T + b
    x = lin(u, p["w1"], p["b1"])
    y = lin(v, p["w1"], p["b1"])
    _ = lin(w, p["w1"], p["b1"])  # z, unused
    h = lin(x, p["wc1"], p["bc1"])
    h = h + lin(x, p["wc2"], p["bc2"])
    h = h - lin(y, p["wc1"], p["bc1"])
    h = h + lin(x, p["wc1"], p["bc1"])
    return h


if __name__ == "__main__":
    key = jax.random.PRNGKey(0)
    kp, ku, kv, kw = jax.random.split(key, 4)
    params = init_params(kp)
    folded = fold_params(params)   # hoisted: folded once, reused per call

    # ---- small demo shape (forced through the Pallas path) ----
    B = 8
    u = jax.random.normal(ku, (B, F_IN), jnp.float32)
    v = jax.random.normal(kv, (B, F_IN), jnp.float32)
    w = jax.random.normal(kw, (B, F_IN), jnp.float32)

    out = model_forward(u, v, w, folded, force_pallas=True)
    out = jax.block_until_ready(out)
    ref = reference_forward(u, v, w, params)
    assert out.shape == (B, F_OUT)
    # folded f32 accumulation reassociates; ~1e-6-level deltas expected
    assert jnp.allclose(out, ref, atol=1e-5, rtol=1e-5), "pallas (small) mismatch"

    # small-batch XLA dispatch path (threshold branch) should agree too
    out_xla = jax.block_until_ready(model_forward(u, v, w, folded))
    assert jnp.allclose(out_xla, ref, atol=1e-5, rtol=1e-5), "xla dispatch mismatch"

    # ---- ragged multi-tile path: B not a multiple of the tile (grid + tail) ----
    B2 = 1000
    ku2, kv2, kw2 = jax.random.split(jax.random.PRNGKey(1), 3)
    u2 = jax.random.normal(ku2, (B2, F_IN), jnp.float32)
    v2 = jax.random.normal(kv2, (B2, F_IN), jnp.float32)
    w2 = jax.random.normal(kw2, (B2, F_IN), jnp.float32)
    out2 = jax.block_until_ready(
        model_forward(u2, v2, w2, folded, tile_b=256, force_pallas=True))
    ref2 = reference_forward(u2, v2, w2, params)
    assert out2.shape == (B2, F_OUT)
    assert jnp.allclose(out2, ref2, atol=1e-5, rtol=1e-5), "pallas (ragged) mismatch"

    print("KERNEL_OK")
</pallas_src>

<mosaic_0001>
module attributes {stable_mosaic.version = 11 : i64} {
  func.func @_fused_kernel(%arg0: i32, %arg1: memref<14xf32, #tpu.memory_space<smem>>, %arg2: memref<3x8xf32, #tpu.memory_space<vmem>>, %arg3: memref<3x8xf32, #tpu.memory_space<vmem>>, %arg4: memref<2x8xf32, #tpu.memory_space<vmem>>) attributes {dimension_semantics = [#tpu.dimension_semantics<parallel>], iteration_bounds = array<i64: 1>, scalar_prefetch = 0 : i64, scratch_operands = 0 : i64, tpu.core_type = #tpu.core_type<tc>, window_params = [{transform_indices = @transform_0, window_bounds = array<i64: 14>}, {transform_indices = @transform_1, window_bounds = array<i64: 3, 8>}, {transform_indices = @transform_2, window_bounds = array<i64: 3, 8>}, {transform_indices = @transform_3, window_bounds = array<i64: 2, 8>}]} {
    %c0 = arith.constant 0 : index
    %c0_0 = arith.constant 0 : index
    %0 = vector.load %arg2[%c0, %c0_0] : memref<3x8xf32, #tpu.memory_space<vmem>>, vector<1x8xf32>
    %c1 = arith.constant 1 : index
    %c0_1 = arith.constant 0 : index
    %1 = vector.load %arg2[%c1, %c0_1] : memref<3x8xf32, #tpu.memory_space<vmem>>, vector<1x8xf32>
    %c2 = arith.constant 2 : index
    %c0_2 = arith.constant 0 : index
    %2 = vector.load %arg2[%c2, %c0_2] : memref<3x8xf32, #tpu.memory_space<vmem>>, vector<1x8xf32>
    %c0_3 = arith.constant 0 : index
    %c0_4 = arith.constant 0 : index
    %3 = vector.load %arg3[%c0_3, %c0_4] : memref<3x8xf32, #tpu.memory_space<vmem>>, vector<1x8xf32>
    %c1_5 = arith.constant 1 : index
    %c0_6 = arith.constant 0 : index
    %4 = vector.load %arg3[%c1_5, %c0_6] : memref<3x8xf32, #tpu.memory_space<vmem>>, vector<1x8xf32>
    %c2_7 = arith.constant 2 : index
    %c0_8 = arith.constant 0 : index
    %5 = vector.load %arg3[%c2_7, %c0_8] : memref<3x8xf32, #tpu.memory_space<vmem>>, vector<1x8xf32>
    %c0_9 = arith.constant 0 : index
    %6 = memref.load %arg1[%c0_9] : memref<14xf32, #tpu.memory_space<smem>>
    %7 = vector.broadcast %6 : f32 to vector<1x8xf32>
    %8 = arith.mulf %7, %0 : vector<1x8xf32>
    %c1_10 = arith.constant 1 : index
    %9 = memref.load %arg1[%c1_10] : memref<14xf32, #tpu.memory_space<smem>>
    %10 = vector.broadcast %9 : f32 to vector<1x8xf32>
    %11 = arith.mulf %10, %1 : vector<1x8xf32>
    %12 = arith.addf %8, %11 : vector<1x8xf32>
    %c2_11 = arith.constant 2 : index
    %13 = memref.load %arg1[%c2_11] : memref<14xf32, #tpu.memory_space<smem>>
    %14 = vector.broadcast %13 : f32 to vector<1x8xf32>
    %15 = arith.mulf %14, %2 : vector<1x8xf32>
    %16 = arith.addf %12, %15 : vector<1x8xf32>
    %c6 = arith.constant 6 : index
    %17 = memref.load %arg1[%c6] : memref<14xf32, #tpu.memory_space<smem>>
    %18 = vector.broadcast %17 : f32 to vector<1x8xf32>
    %19 = arith.mulf %18, %3 : vector<1x8xf32>
    %20 = arith.subf %16, %19 : vector<1x8xf32>
    %c7 = arith.constant 7 : index
    %21 = memref.load %arg1[%c7] : memref<14xf32, #tpu.memory_space<smem>>
    %22 = vector.broadcast %21 : f32 to vector<1x8xf32>
    %23 = arith.mulf %22, %4 : vector<1x8xf32>
    %24 = arith.subf %20, %23 : vector<1x8xf32>
    %c8 = arith.constant 8 : index
    %25 = memref.load %arg1[%c8] : memref<14xf32, #tpu.memory_space<smem>>
    %26 = vector.broadcast %25 : f32 to vector<1x8xf32>
    %27 = arith.mulf %26, %5 : vector<1x8xf32>
    %28 = arith.subf %24, %27 : vector<1x8xf32>
    %c12 = arith.constant 12 : index
    %29 = memref.load %arg1[%c12] : memref<14xf32, #tpu.memory_space<smem>>
    %30 = vector.broadcast %29 : f32 to vector<1x8xf32>
    %31 = arith.addf %28, %30 : vector<1x8xf32>
    %c3 = arith.constant 3 : index
    %32 = memref.load %arg1[%c3] : memref<14xf32, #tpu.memory_space<smem>>
    %33 = vector.broadcast %32 : f32 to vector<1x8xf32>
    %34 = arith.mulf %33, %0 : vector<1x8xf32>
    %c4 = arith.constant 4 : index
    %35 = memref.load %arg1[%c4] : memref<14xf32, #tpu.memory_space<smem>>
    %36 = vector.broadcast %35 : f32 to vector<1x8xf32>
    %37 = arith.mulf %36, %1 : vector<1x8xf32>
    %38 = arith.addf %34, %37 : vector<1x8xf32>
    %c5 = arith.constant 5 : index
    %39 = memref.load %arg1[%c5] : memref<14xf32, #tpu.memory_space<smem>>
    %40 = vector.broadcast %39 : f32 to vector<1x8xf32>
    %41 = arith.mulf %40, %2 : vector<1x8xf32>
    %42 = arith.addf %38, %41 : vector<1x8xf32>
    %c9 = arith.constant 9 : index
    %43 = memref.load %arg1[%c9] : memref<14xf32, #tpu.memory_space<smem>>
    %44 = vector.broadcast %43 : f32 to vector<1x8xf32>
    %45 = arith.mulf %44, %3 : vector<1x8xf32>
    %46 = arith.subf %42, %45 : vector<1x8xf32>
    %c10 = arith.constant 10 : index
    %47 = memref.load %arg1[%c10] : memref<14xf32, #tpu.memory_space<smem>>
    %48 = vector.broadcast %47 : f32 to vector<1x8xf32>
    %49 = arith.mulf %48, %4 : vector<1x8xf32>
    %50 = arith.subf %46, %49 : vector<1x8xf32>
    %c11 = arith.constant 11 : index
    %51 = memref.load %arg1[%c11] : memref<14xf32, #tpu.memory_space<smem>>
    %52 = vector.broadcast %51 : f32 to vector<1x8xf32>
    %53 = arith.mulf %52, %5 : vector<1x8xf32>
    %54 = arith.subf %50, %53 : vector<1x8xf32>
    %c13 = arith.constant 13 : index
    %55 = memref.load %arg1[%c13] : memref<14xf32, #tpu.memory_space<smem>>
    %56 = vector.broadcast %55 : f32 to vector<1x8xf32>
    %57 = arith.addf %54, %56 : vector<1x8xf32>
    %58 = tpu.concatenate %31, %57 in 0 : vector<1x8xf32>, vector<1x8xf32> -> vector<2x8xf32>
    %c0_12 = arith.constant 0 : index
    %c0_13 = arith.constant 0 : index
    %59 = vector.load %arg4[%c0_12, %c0_13] : memref<2x8xf32, #tpu.memory_space<vmem>>, vector<2x8xf32>
    tpu.vector_store %arg4[%c0_12, %c0_13], %58 {strides = array<i32>} : memref<2x8xf32, #tpu.memory_space<vmem>>, vector<2x8xf32>,
    return
  }
  func.func @transform_0(%arg0: i32) -> i32 {
    %c0_i32 = arith.constant 0 : i32
    %c0_i32_0 = arith.constant 0 : i32
    return %c0_i32 : i32
  }
  func.func @transform_1(%arg0: i32) -> (i32, i32) {
    %c0_i32 = arith.constant 0 : i32
    %c0_i32_0 = arith.constant 0 : i32
    return %c0_i32, %arg0 : i32, i32
  }
  func.func @transform_2(%arg0: i32) -> (i32, i32) {
    %c0_i32 = arith.constant 0 : i32
    %c0_i32_0 = arith.constant 0 : i32
    return %c0_i32, %arg0 : i32, i32
  }
  func.func @transform_3(%arg0: i32) -> (i32, i32) {
    %c0_i32 = arith.constant 0 : i32
    %c0_i32_0 = arith.constant 0 : i32
    return %c0_i32, %arg0 : i32, i32
  }
}

</mosaic_0001>

<bundles_post_ra>
// kernel: tpu_custom_call.1
= control target key start
LH: loop header
LB: loop body
LE: loop exit
PB: predicated region body
PF: predicated region fallthrough
CT: control target
= control target key end

     0   :  { %8 = vsyncpa [#allocation5], 0  ;;  %s275_s0 = inlined_call_operand.hbm [shape: f32[14], index: 0, kind: input, shape index: {}]   ;;  %s276_s1 = inlined_call_operand.hbm [shape: f32[3,8], index: 1, kind: input, shape index: {}]   ;;  %s277_s2 = inlined_call_operand.vmem [shape: f32[3,8], index: 2, kind: input, shape index: {}]   ;;  %s278_s3 = inlined_call_operand.hbm [shape: f32[2,8], index: 3, kind: output, shape index: {}]  }
   0x1   :  { %9 = vsyncpa [#allocation3], 0 }
   0x2   :  { %10 = vsyncpa [#allocation4], 0  ;;  %s135_s14 = scalar_lea.hbm %s275_s0, 16 }
   0x3   :  { %p136_p0 = scmp.ne.s32.totalorder %s275_s0, %s135_s14  ;;  %p139_p1 = scmp.lt.u32.totalorder %s135_s14, %s275_s0 }
   0x5   :  { %p141_p2 = pnand %p139_p1, %p136_p0 }
   0x7   :  { %144 = shalt.err (!%p141_p2)
}
   0x8   :  { %s195_s19 = smov [#allocation2]   ;;  %s196_s22 = smov [#allocation6]  }
   0x9   :  { %18 = dma.hbm_to_smem %s275_s0, 16, %s195_s19, [#allocation5]  }
   0xa   :  { %s25_s23 = sshll.u32 %s196_s22, 4  ;;  %s145_s26 = scalar_lea.hbm %s276_s1, 64  ;;  %s26_s23 = int_to_ptr.vmem [resolvable:$true] %s25_s23 }
   0xb   :  { %p146_p3 = scmp.ne.s32.totalorder %s276_s1, %s145_s26  ;;  %p149_p4 = scmp.lt.u32.totalorder %s145_s26, %s276_s1 }
   0xd   :  { %p151_p5 = pnand %p149_p4, %p146_p3 }
   0xf   :  { %154 = shalt.err (!%p151_p5)
}
  0x10   :  { %s155_s4 = scalar_lea.vmem %s26_s23, 64  ;;  %p160_p7 = scmp.lt.s32.totalorder %s26_s23, %s26_s23 }
  0x11   :  { %p156_p6 = scmp.ne.s32.totalorder %s26_s23, %s155_s4  ;;  %p161_p8 = scmp.lt.s32.totalorder %s155_s4, %s155_s4 }
  0x13   :  { %p162_p9 = por %p161_p8, %p160_p7 }
  0x15   :  { %p163_p10 = pnand %p162_p9, %p156_p6 }
  0x17   :  { %166 = shalt.err (!%p163_p10)
}
  0x18   :  { %28 = dma.hbm_to_vmem [thread:$0]  %s276_s1, 64, %s26_s23, [#allocation3]  }
  0x19   :  { %189 = dma.done.wait [#allocation5], 16  }
  0x1a   :  { %190 = vsyncadd [#allocation5], 4294967280 }
  0x1b   :  { %191 = dma.done.wait [#allocation3], 64  }
  0x1c   :  { %192 = vsyncadd [#allocation3], 4294967232 }
  0x1d   :  { %37 = sfence }
  0x1e   :  { %s44_s6 = sld [smem:[#allocation2]]  ;;  %s119_s7 = sld [smem:[#allocation2 + $0x1]]  ;;  %v38_v0 = vld [vmem:[#allocation6] sm:$0x1]  ;;  %v39_v1 = vld [vmem:[#allocation6 + $0x1] sm:$0x1] }
  0x1f   :  { %s120_s8 = sld [smem:[#allocation2 + $0x2]]  ;;  %s121_s9 = sld [smem:[#allocation2 + $0x6]]  ;;  %v40_v4 = vld [vmem:[#allocation6 + $0x2] sm:$0x1]  ;;  %v41_v9 = vld [vmem:[%s277_s2] sm:$0x1] }
  0x20   :  { %s122_s10 = sld [smem:[#allocation2 + $0x7]]  ;;  %s242_s11 = sld [smem:[#allocation2 + $0x8]]  ;;  %v42_v12 = vld [vmem:[%s277_s2 + $0x1] sm:$0x1]  ;;  %v43_v29 = vld [vmem:[%s277_s2 + $0x2] sm:$0x1] }
  0x21   :  { %s125_s12 = sld [smem:[#allocation2 + $0x3]]  ;;  %s126_s13 = sld [smem:[#allocation2 + $0x4]]  ;;  %vm99_vm0 = vcmask 1040384   ;;  %vm101_vm1 = vcmask 58368  }
  0x22   :  { %s127_s14 = sld [smem:[#allocation2 + $0x5]]  ;;  %s244_s15 = sld [smem:[#allocation2 + $0x9]] }
  0x23   :  { %s246_s16 = sld [smem:[#allocation2 + $0xa]]  ;;  %s248_s1 = sld [smem:[#allocation2 + $0xb]] }
  0x24   :  { %v45_v2 = vstv %s44_s6  ;;  %v48_v3 = vstv %s119_s7  ;;  %s124_s21 = sld [smem:[#allocation2 + $0xc]]  ;;  %s131_s22 = sld [smem:[#allocation2 + $0xd]] }
  0x25   :  { %v46_v5 = vmul.f32 %v45_v2, %v38_v0  ;;  %v49_v6 = vmul.f32 %v48_v3, %v39_v1  ;;  %v52_v7 = vstv %s120_s8  ;;  %v56_v8 = vstv %s121_s9  ;;  %s197_s25 = smov [#allocation7]  }
  0x26   :  { %v53_v10 = vmul.f32 %v52_v7, %v40_v4  ;;  %v60_v11 = vstv %s122_s10  ;;  %v57_v14 = vmul.f32 %v56_v8, %v41_v9  ;;  %v64_v23 = vstv %s242_s11  ;;  %s109_s26 = sshll.u32 %s197_s25, 4  ;;  %s110_s26 = int_to_ptr.vmem [resolvable:$true] %s109_s26 }
  0x27   :  { %v50_v13 = vadd.f32 %v49_v6, %v46_v5  ;;  %v61_v15 = vmul.f32 %v60_v11, %v42_v12  ;;  %v71_v16 = vstv %s125_s12  ;;  %v74_v17 = vstv %s126_s13  ;;  %s167_s2 = scalar_lea.vmem %s110_s26, 32  ;;  %p172_p12 = scmp.lt.s32.totalorder %s110_s26, %s110_s26 }
  0x28   :  { %v78_v18 = vstv %s127_s14  ;;  %v72_v20 = vmul.f32 %v71_v16, %v38_v0  ;;  %v75_v21 = vmul.f32 %v74_v17, %v39_v1  ;;  %v82_v24 = vstv %s244_s15  ;;  %p168_p11 = scmp.ne.s32.totalorder %s110_s26, %s167_s2  ;;  %p173_p13 = scmp.lt.s32.totalorder %s167_s2, %s167_s2 }
  0x29   :  { %v54_v19 = vadd.f32 %v53_v10, %v50_v13  ;;  %v79_v22 = vmul.f32 %v78_v18, %v40_v4  ;;  %v86_v25 = vstv %s246_s16  ;;  %v83_v28 = vmul.f32 %v82_v24, %v41_v9 }
  0x2a   :  { %v76_v27 = vadd.f32 %v75_v21, %v72_v20  ;;  %v90_v30 = vstv %s248_s1  ;;  %v65_v32 = vmul.f32 %v64_v23, %v43_v29  ;;  %v87_v34 = vmul.f32 %v86_v25, %v42_v12  ;;  %p174_p0 = por %p173_p13, %p172_p12 }
  0x2b   :  { %v58_v26 = vsub.f32 %v54_v19, %v57_v14  ;;  %v91_v36 = vmul.f32 %v90_v30, %v43_v29  ;;  %v68_v39 = vstv %s124_s21  ;;  %v94_v40 = vstv %s131_s22 }
  0x2c   :  { %v80_v33 = vadd.f32 %v79_v22, %v76_v27  ;;  %p175_p1 = pnand %p174_p0, %p168_p11 }
  0x2d   :  { %v62_v31 = vsub.f32 %v58_v26, %v61_v15 }
  0x2e   :  { %v84_v35 = vsub.f32 %v80_v33, %v83_v28 }
  0x2f   :  { %v66_v37 = vsub.f32 %v62_v31, %v65_v32 }
  0x30   :  { %v88_v38 = vsub.f32 %v84_v35, %v87_v34 }
  0x31   :  { %v69_v42 = vadd.f32 %v68_v39, %v66_v37 }
  0x32   :  { %v92_v41 = vsub.f32 %v88_v38, %v91_v36 }
  0x34   :  { %v95_v43 = vadd.f32 %v94_v40, %v92_v41 }
  0x36   :  { %v97_v44 = vrot.slane %v95_v43, 7 }
  0x38   :  { %v100_v45 = vsel %vm99_vm0, %v69_v42, %v97_v44 }
  0x39   :  { %102 = vst.msk [vmem:[#allocation7] sm:$0x3] %vm101_vm1, %v100_v45 }
  0x3a   :  { %178 = shalt.err (!%p175_p1)
}
  0x3b   :  { %s179_s29 = scalar_lea.hbm %s278_s3, 32 }
  0x3c   :  { %p180_p2 = scmp.ne.s32.totalorder %s278_s3, %s179_s29  ;;  %p183_p3 = scmp.lt.u32.totalorder %s179_s29, %s278_s3 }
  0x3e   :  { %p185_p4 = pnand %p183_p3, %p180_p2 }
  0x40   :  { %188 = shalt.err (!%p185_p4)
}
  0x41   :  { %112 = dma.vmem_to_hbm [thread:$0]  %s110_s26, 32, %s278_s3, [#allocation4]  }
  0x42   :  { %193 = dma.done.wait [#allocation4], 32  }
  0x43   :  { %194 = vsyncadd [#allocation4], 4294967264 }
  0x44   :  { %116 = vsyncpa [#allocation3], 1 }
  0x45   :  { %117 = vsyncpa [#allocation4], 1 }
  0x46   :  { %118 = vsyncpa [#allocation5], 1 }

</bundles_post_ra>
